<compile_context>
chip_gen: v7x
topology: tpu7x:2x2x1
jax: 0.10.0
libtpu: 0.0.40
codegen_flags: <defaults>
</compile_context>

<pallas_src>
import functools
import math

import jax
import jax.numpy as jnp
from jax.experimental import pallas as pl
from jax.experimental.pallas import tpu as pltpu


def _focal_loss_kernel(*refs, gamma, ignore_index, num_classes, rows_total,
                       has_alpha):
    """One (batch, chunk, spatial-tile) grid step.

    refs (has_alpha=True):  x_ref (1,C,TR,128), y_ref (1,1,TR,128) int32,
                            ay_ref (1,1,TR,128) f32, sum_ref (1,1,TR,128) f32
    refs (has_alpha=False): x_ref, y_ref, sum_ref
    sum_ref is resident across the innermost (spatial-tile) grid axis.
    """
    if has_alpha:
        x_ref, y_ref, ay_ref, sum_ref = refs
    else:
        x_ref, y_ref, sum_ref = refs
        ay_ref = None

    ci = pl.program_id(1)
    t = pl.program_id(2)
    g = ci * pl.num_programs(2) + t          # global spatial-tile index

    # Fresh accumulator block for each (batch, chunk): zero on its first tile.
    @pl.when(t == 0)
    def _():
        sum_ref[...] = jnp.zeros_like(sum_ref)

    x = x_ref[...].astype(jnp.float32)       # (1, C, TR, 128)
    y = y_ref[...]                           # (1, 1, TR, 128) int32
    _, c, tr, _ = x.shape

    # log-softmax over the class axis (axis=1): C-way elementwise VPU ops
    # across distinct vreg sets -- no cross-sublane (XLU) reductions.
    m = jnp.max(x, axis=1, keepdims=True)                        # (1,1,TR,128)
    z = x - m
    lse = jnp.log(jnp.sum(jnp.exp(z), axis=1, keepdims=True))    # (1,1,TR,128)

    # Gather z[:, y] via a one-hot over the class axis (no dynamic gather on
    # TPU).  Labels outside [0, C) other than ignore_index contribute zero
    # loss (documented deviation: PyTorch would raise).
    class_ids = jax.lax.broadcasted_iota(jnp.int32, x.shape, 1)
    onehot = class_ids == y                                      # (1,C,TR,128)
    z_y = jnp.sum(jnp.where(onehot, z, 0.0), axis=1, keepdims=True)
    log_pt = z_y - lse                                           # (1,1,TR,128)

    if has_alpha:
        ce = -ay_ref[...].astype(jnp.float32) * log_pt   # weighted NLL, 'none'
    else:
        ce = -log_pt
    pt = jnp.exp(log_pt)

    gf = float(gamma)
    if gf == 0.0:
        loss = ce
    else:
        if gf == round(gf) and 1.0 <= gf <= 4.0:
            # small integer gamma: multiply chain (avoids exp/log on the EUP)
            d = 1.0 - pt
            focal = d
            for _ in range(int(gf) - 1):
                focal = focal * d
        else:
            focal = jnp.power(1.0 - pt, jnp.float32(gf))
        loss = focal * ce

    # Validity: real class label, not ignore_index, and this 128-row lies
    # within the true spatial extent (ragged last tiles hold garbage rows ->
    # jnp.where so NaN/Inf garbage cannot leak into the sums).
    row = jax.lax.broadcasted_iota(jnp.int32, y.shape, 2)
    in_bounds = (g * tr + row) < rows_total
    valid = (y != ignore_index) & (y >= 0) & (y < num_classes) & in_bounds

    sum_ref[...] += jnp.where(valid, loss, 0.0)


def focal_loss_ce(x, y, alpha=None, gamma=0.0, reduction='mean',
                  ignore_index=-100, tile_rows=None):
    """Focal loss forward.  x: (B, C) or (B, C, d1..dK); y: (B,) or (B, d1..dK)."""
    if reduction not in ('mean', 'sum'):
        # TODO(synk): reduction='none' would need a dynamically-shaped output
        # of only the unignored rows; only 'mean'/'sum' are implemented here.
        raise NotImplementedError("only 'mean' and 'sum' reductions supported")

    x = jnp.asarray(x)
    y = jnp.asarray(y)

    if x.ndim > 2:
        # NCHW-native: (B, C, d1..dK) -> (B, C, S) is a free contiguous reshape.
        b, c = x.shape[0], x.shape[1]
        s = math.prod(x.shape[2:])
        x3 = x.reshape(b, c, s)
        y2 = y.reshape(b, s).astype(jnp.int32)
    else:
        # (N, C): put N on the spatial axis -> (1, C, N).
        # TODO(synk): this 2-D path pays one XLA transpose pass; the common
        # dense-prediction (ndim > 2) path is copy-free.
        n, c = x.shape
        b, s = 1, n
        x3 = x.T.reshape(1, c, s)
        y2 = y.reshape(1, s).astype(jnp.int32)

    # 'mean' denominator: plain count of unignored positions (matches the
    # module's loss.mean() over the mask-selected rows) -- computed in plain
    # JAX; the in-kernel count accumulator is gone.
    n_valid = jnp.sum((y2 != ignore_index).astype(jnp.float32))

    # Pad the spatial axis to a multiple of 128 so (B,C,S) -> (B,C,Sr,128) is a
    # free reshape; labels pad with ignore_index so padded positions are inert.
    sr = -(-s // 128)
    s_pad = sr * 128
    if s_pad != s:
        # TODO(synk): pays one XLA pad pass over the logits; dense-prediction
        # shapes with S % 128 == 0 skip it entirely.
        x3 = jnp.pad(x3, ((0, 0), (0, 0), (0, s_pad - s)))
        y2p = jnp.pad(y2, ((0, 0), (0, s_pad - s)), constant_values=ignore_index)
    else:
        y2p = y2
    x4 = x3.reshape(b, c, sr, 128)
    y4 = y2p.reshape(b, 1, sr, 128)

    has_alpha = alpha is not None
    if has_alpha:
        alpha_vec = jnp.asarray(alpha, jnp.float32).reshape(c)
        # Precompute alpha[y] in JAX (tiny gather) -> one f32/position stream.
        ay4 = alpha_vec[jnp.clip(y2p, 0, c - 1)].astype(jnp.float32)
        ay4 = ay4.reshape(b, 1, sr, 128)

    itemsize = jnp.dtype(x4.dtype).itemsize

    # Byte-based tile sizing: ~2 MiB of logits per tile (4 MiB on parts with
    # >= 100 MiB of VMEM, i.e. v5e/v6e-class chips).  Cap VMEM at 48 MiB so
    # v7x's 64 MiB physical VMEM keeps headroom.
    target_bytes = 2 * 1024 * 1024
    vmem_cap = 48 * 1024 * 1024
    try:
        if pltpu.get_tpu_info().vmem_capacity_bytes >= 100 * 1024 * 1024:
            target_bytes = 4 * 1024 * 1024
            vmem_cap = 96 * 1024 * 1024
    except Exception:
        pass

    if tile_rows is None:
        tr = (target_bytes // (c * 128 * itemsize)) // 8 * 8
        tr = int(max(8, min(tr, 4096)))
    else:
        tr = max(8, (int(tile_rows) // 8) * 8)
    if tr >= sr:
        tr = sr                     # full extent (legal even if sr % 8 != 0)
    n_tiles = -(-sr // tr)

    # Second "parallel" grid axis over spatial chunks so both TensorCores of a
    # dual-TC (v7x) chip stay busy when B == 1; no-op on single-TC chips.
    nc = 2 if (b == 1 and n_tiles >= 2 and n_tiles % 2 == 0) else 1
    tpc = n_tiles // nc

    # VMEM budget: double-buffered input streams + resident accumulator +
    # in-kernel f32 temporaries (f32 upcast, z, exp(z), one-hot, ...).
    xb = c * tr * 128 * itemsize
    posb = tr * 128 * 4
    n_pos_streams = 1 + (1 if has_alpha else 0)        # labels (+ alpha[y])
    need = 2 * (xb + n_pos_streams * posb) + posb + 8 * c * tr * 128 * 4
    vmem_limit = int(min(max(2 * need, 32 * 1024 * 1024), vmem_cap))

    kernel = functools.partial(_focal_loss_kernel,
                               gamma=float(gamma),
                               ignore_index=int(ignore_index),
                               num_classes=int(c),
                               rows_total=int(sr),
                               has_alpha=has_alpha)

    idx = lambda bi, ci, t: (bi, 0, ci * tpc + t, 0)
    in_specs = [pl.BlockSpec((1, c, tr, 128), idx),    # logits
                pl.BlockSpec((1, 1, tr, 128), idx)]    # labels
    args = [x4, y4]
    if has_alpha:
        in_specs.append(pl.BlockSpec((1, 1, tr, 128), idx))   # alpha[y]
        args.append(ay4)

    sum_part = pl.pallas_call(
        kernel,
        out_shape=jax.ShapeDtypeStruct((b, nc, tr, 128), jnp.float32),
        grid_spec=pltpu.PrefetchScalarGridSpec(
            num_scalar_prefetch=0,
            grid=(b, nc, tpc),
            in_specs=in_specs,
            out_specs=pl.BlockSpec((1, 1, tr, 128),
                                   lambda bi, ci, t: (bi, ci, 0, 0)),
        ),
        compiler_params=pltpu.CompilerParams(
            dimension_semantics=("parallel", "parallel", "arbitrary"),
            vmem_limit_bytes=vmem_limit),
    )(*args)

    loss_sum = jnp.sum(sum_part)
    if reduction == 'sum':
        return loss_sum
    # 'mean' over unignored positions; 0.0 when nothing is unignored (matches
    # the PyTorch module, which returns torch.tensor(0.0) in that case).
    return jnp.where(n_valid > 0, loss_sum / jnp.maximum(n_valid, 1.0), 0.0)


def _reference(x, y, alpha, gamma, ignore_index, reduction):
    """Pure-JAX reference implementing the PyTorch module's math."""
    if x.ndim > 2:
        c = x.shape[1]
        perm = (0,) + tuple(range(2, x.ndim)) + (1,)
        xf = jnp.transpose(x, perm).reshape(-1, c)
        yf = y.reshape(-1)
    else:
        xf, yf = x, y
    c = xf.shape[-1]
    valid = yf != ignore_index
    log_p = jax.nn.log_softmax(xf.astype(jnp.float32), axis=-1)
    y_safe = jnp.where(valid, yf, 0).astype(jnp.int32)
    log_pt = jnp.take_along_axis(log_p, y_safe[:, None], axis=-1)[:, 0]
    a = jnp.ones((c,), jnp.float32) if alpha is None else jnp.asarray(alpha, jnp.float32)
    ce = -a[y_safe] * log_pt
    focal = (1.0 - jnp.exp(log_pt)) ** gamma
    per_row = jnp.where(valid, focal * ce, 0.0)
    if reduction == 'sum':
        return jnp.sum(per_row)
    n_valid = jnp.sum(valid.astype(jnp.float32))
    return jnp.where(n_valid > 0, jnp.sum(per_row) / jnp.maximum(n_valid, 1.0), 0.0)


if __name__ == "__main__":
    key = jax.random.PRNGKey(0)
    k = jax.random.split(key, 10)

    B, C, H, W = 2, 4, 16, 16
    alpha = jnp.linspace(0.5, 2.0, C, dtype=jnp.float32)

    # --- Test 1: NCHW (S=256, free 4-D reshape), gamma=2, alpha, ignore, mean
    x1 = jax.random.normal(k[0], (B, C, H, W), jnp.float32)
    y1 = jax.random.randint(k[1], (B, H, W), 0, C).astype(jnp.int32)
    y1 = jnp.where(jax.random.uniform(k[2], (B, H, W)) < 0.1, jnp.int32(-100), y1)
    out1 = focal_loss_ce(x1, y1, alpha=alpha, gamma=2.0, reduction='mean',
                         ignore_index=-100)
    jax.block_until_ready(out1)
    ref1 = _reference(x1, y1, alpha, 2.0, -100, 'mean')
    assert jnp.allclose(out1, ref1, rtol=1e-4, atol=1e-5), (out1, ref1)

    # --- Test 2: ragged spatial (S=289 -> padded to 384), sum
    H2 = W2 = 17
    x2 = jax.random.normal(k[3], (B, C, H2, W2), jnp.float32)
    y2 = jax.random.randint(k[4], (B, H2, W2), 0, C).astype(jnp.int32)
    y2 = jnp.where(jax.random.uniform(k[5], (B, H2, W2)) < 0.1, jnp.int32(-100), y2)
    out2 = focal_loss_ce(x2, y2, alpha=alpha, gamma=2.0, reduction='sum',
                         ignore_index=-100)
    jax.block_until_ready(out2)
    ref2 = _reference(x2, y2, alpha, 2.0, -100, 'sum')
    assert jnp.allclose(out2, ref2, rtol=1e-4, atol=1e-4), (out2, ref2)

    # --- Test 3: plain (N, C), gamma=0 (plain CE), no alpha, mean
    x3 = jax.random.normal(k[6], (8, C), jnp.float32)
    y3 = jax.random.randint(k[7], (8,), 0, C).astype(jnp.int32)
    out3 = focal_loss_ce(x3, y3, alpha=None, gamma=0.0, reduction='mean',
                         ignore_index=-100)
    jax.block_until_ready(out3)
    ref3 = _reference(x3, y3, None, 0.0, -100, 'mean')
    assert jnp.allclose(out3, ref3, rtol=1e-4, atol=1e-5), (out3, ref3)

    # --- Test 4: B=1, multi-tile, ragged row tile, dual-chunk parallel axis
    x4 = jax.random.normal(k[8], (1, C, 40, 40), jnp.float32)   # S = 1600
    y4 = jax.random.randint(k[9], (1, 40, 40), 0, C).astype(jnp.int32)
    out4 = focal_loss_ce(x4, y4, alpha=alpha, gamma=3.0, reduction='mean',
                         ignore_index=-100, tile_rows=8)
    jax.block_until_ready(out4)
    ref4 = _reference(x4, y4, alpha, 3.0, -100, 'mean')
    assert jnp.allclose(out4, ref4, rtol=1e-4, atol=1e-5), (out4, ref4)

    print("KERNEL_OK")
</pallas_src>

<mosaic_0001>
module attributes {stable_mosaic.version = 11 : i64} {
  func.func @_focal_loss_kernel(%arg0: i32, %arg1: i32, %arg2: i32, %arg3: memref<1x4x2x128xf32, #tpu.memory_space<vmem>>, %arg4: memref<1x1x2x128xi32, #tpu.memory_space<vmem>>, %arg5: memref<1x1x2x128xf32, #tpu.memory_space<vmem>>, %arg6: memref<1x1x2x128xf32, #tpu.memory_space<vmem>>) attributes {dimension_semantics = [#tpu.dimension_semantics<parallel>, #tpu.dimension_semantics<parallel>, #tpu.dimension_semantics<arbitrary>], iteration_bounds = array<i64: 2, 1, 1>, scalar_prefetch = 0 : i64, scratch_operands = 0 : i64, tpu.core_type = #tpu.core_type<tc>, window_params = [{transform_indices = @transform_0, window_bounds = array<i64: 1, 4, 2, 128>}, {transform_indices = @transform_1, window_bounds = array<i64: 1, 1, 2, 128>}, {transform_indices = @transform_2, window_bounds = array<i64: 1, 1, 2, 128>}, {transform_indices = @transform_3, window_bounds = array<i64: 1, 1, 2, 128>}]} {
    %c1_i32 = arith.constant 1 : i32
    %0 = arith.muli %arg1, %c1_i32 : i32
    %1 = arith.addi %0, %arg2 : i32
    %c0_i32 = arith.constant 0 : i32
    %2 = arith.cmpi eq, %arg2, %c0_i32 : i32
    %3 = arith.extui %2 : i1 to i32
    %c0_i32_0 = arith.constant 0 : i32
    %4 = arith.cmpi ne, %3, %c0_i32_0 : i32
    scf.if %4 {
      %cst_28 = arith.constant 0.000000e+00 : f32
      %52 = vector.broadcast %cst_28 : f32 to vector<1x1x2x128xf32>
      %c0_29 = arith.constant 0 : index
      %c0_30 = arith.constant 0 : index
      %c0_31 = arith.constant 0 : index
      %c0_32 = arith.constant 0 : index
      %53 = vector.load %arg6[%c0_29, %c0_30, %c0_31, %c0_32] : memref<1x1x2x128xf32, #tpu.memory_space<vmem>>, vector<1x1x2x128xf32>
      tpu.vector_store %arg6[%c0_29, %c0_30, %c0_31, %c0_32], %52 {strides = array<i32>} : memref<1x1x2x128xf32, #tpu.memory_space<vmem>>, vector<1x1x2x128xf32>,
    } else {
    }
    %c0 = arith.constant 0 : index
    %c0_1 = arith.constant 0 : index
    %c0_2 = arith.constant 0 : index
    %c0_3 = arith.constant 0 : index
    %5 = vector.load %arg3[%c0, %c0_1, %c0_2, %c0_3] : memref<1x4x2x128xf32, #tpu.memory_space<vmem>>, vector<1x4x2x128xf32>
    %c0_4 = arith.constant 0 : index
    %c0_5 = arith.constant 0 : index
    %c0_6 = arith.constant 0 : index
    %c0_7 = arith.constant 0 : index
    %6 = vector.load %arg4[%c0_4, %c0_5, %c0_6, %c0_7] : memref<1x1x2x128xi32, #tpu.memory_space<vmem>>, vector<1x1x2x128xi32>
    %cst = arith.constant dense<0xFF800000> : vector<1x2x128xf32>
    %7 = vector.multi_reduction <maximumf>, %5, %cst [1] : vector<1x4x2x128xf32> to vector<1x2x128xf32>
    %8 = vector.shape_cast %7 : vector<1x2x128xf32> to vector<1x1x2x128xf32>
    %9 = vector.broadcast %8 : vector<1x1x2x128xf32> to vector<1x4x2x128xf32>
    %10 = arith.subf %5, %9 : vector<1x4x2x128xf32>
    %11 = math.exp %10 : vector<1x4x2x128xf32>
    %cst_8 = arith.constant dense<0.000000e+00> : vector<1x2x128xf32>
    %12 = vector.multi_reduction <add>, %11, %cst_8 [1] : vector<1x4x2x128xf32> to vector<1x2x128xf32>
    %13 = vector.shape_cast %12 : vector<1x2x128xf32> to vector<1x1x2x128xf32>
    %14 = math.log %13 : vector<1x1x2x128xf32>
    %15 = tpu.iota {dimensions = array<i32: 1>} : vector<1x4x2x128xi32>
    %16 = vector.broadcast %6 : vector<1x1x2x128xi32> to vector<1x4x2x128xi32>
    %17 = arith.cmpi eq, %15, %16 : vector<1x4x2x128xi32>
    %cst_9 = arith.constant 0.000000e+00 : f32
    %18 = vector.broadcast %cst_9 : f32 to vector<1x4x2x128xf32>
    %19 = arith.select %17, %10, %18 : vector<1x4x2x128xi1>, vector<1x4x2x128xf32>
    %cst_10 = arith.constant dense<0.000000e+00> : vector<1x2x128xf32>
    %20 = vector.multi_reduction <add>, %19, %cst_10 [1] : vector<1x4x2x128xf32> to vector<1x2x128xf32>
    %21 = vector.shape_cast %20 : vector<1x2x128xf32> to vector<1x1x2x128xf32>
    %22 = arith.subf %21, %14 : vector<1x1x2x128xf32>
    %c0_11 = arith.constant 0 : index
    %c0_12 = arith.constant 0 : index
    %c0_13 = arith.constant 0 : index
    %c0_14 = arith.constant 0 : index
    %23 = vector.load %arg5[%c0_11, %c0_12, %c0_13, %c0_14] : memref<1x1x2x128xf32, #tpu.memory_space<vmem>>, vector<1x1x2x128xf32>
    %cst_15 = arith.constant 0.000000e+00 : f32
    %24 = vector.broadcast %cst_15 : f32 to vector<1x1x2x128xf32>
    %25 = arith.subf %24, %23 : vector<1x1x2x128xf32>
    %26 = arith.mulf %25, %22 : vector<1x1x2x128xf32>
    %27 = math.exp %22 : vector<1x1x2x128xf32>
    %cst_16 = arith.constant 1.000000e+00 : f32
    %28 = vector.broadcast %cst_16 : f32 to vector<1x1x2x128xf32>
    %29 = arith.subf %28, %27 : vector<1x1x2x128xf32>
    %30 = arith.mulf %29, %29 : vector<1x1x2x128xf32>
    %31 = arith.mulf %30, %26 : vector<1x1x2x128xf32>
    %32 = tpu.iota {dimensions = array<i32: 2>} : vector<1x1x2x128xi32>
    %c2_i32 = arith.constant 2 : i32
    %33 = arith.muli %1, %c2_i32 : i32
    %34 = vector.broadcast %33 : i32 to vector<1x1x2x128xi32>
    %35 = arith.addi %34, %32 : vector<1x1x2x128xi32>
    %c2_i32_17 = arith.constant 2 : i32
    %36 = vector.broadcast %c2_i32_17 : i32 to vector<1x1x2x128xi32>
    %37 = arith.cmpi slt, %35, %36 : vector<1x1x2x128xi32>
    %c-100_i32 = arith.constant -100 : i32
    %38 = vector.broadcast %c-100_i32 : i32 to vector<1x1x2x128xi32>
    %39 = arith.cmpi ne, %6, %38 : vector<1x1x2x128xi32>
    %c0_i32_18 = arith.constant 0 : i32
    %40 = vector.broadcast %c0_i32_18 : i32 to vector<1x1x2x128xi32>
    %41 = arith.cmpi sge, %6, %40 : vector<1x1x2x128xi32>
    %42 = arith.andi %39, %41 : vector<1x1x2x128xi1>
    %c4_i32 = arith.constant 4 : i32
    %43 = vector.broadcast %c4_i32 : i32 to vector<1x1x2x128xi32>
    %44 = arith.cmpi slt, %6, %43 : vector<1x1x2x128xi32>
    %45 = arith.andi %42, %44 : vector<1x1x2x128xi1>
    %46 = arith.andi %45, %37 : vector<1x1x2x128xi1>
    %c0_19 = arith.constant 0 : index
    %c0_20 = arith.constant 0 : index
    %c0_21 = arith.constant 0 : index
    %c0_22 = arith.constant 0 : index
    %47 = vector.load %arg6[%c0_19, %c0_20, %c0_21, %c0_22] : memref<1x1x2x128xf32, #tpu.memory_space<vmem>>, vector<1x1x2x128xf32>
    %cst_23 = arith.constant 0.000000e+00 : f32
    %48 = vector.broadcast %cst_23 : f32 to vector<1x1x2x128xf32>
    %49 = arith.select %46, %31, %48 : vector<1x1x2x128xi1>, vector<1x1x2x128xf32>
    %50 = arith.addf %47, %49 : vector<1x1x2x128xf32>
    %c0_24 = arith.constant 0 : index
    %c0_25 = arith.constant 0 : index
    %c0_26 = arith.constant 0 : index
    %c0_27 = arith.constant 0 : index
    %51 = vector.load %arg6[%c0_24, %c0_25, %c0_26, %c0_27] : memref<1x1x2x128xf32, #tpu.memory_space<vmem>>, vector<1x1x2x128xf32>
    tpu.vector_store %arg6[%c0_24, %c0_25, %c0_26, %c0_27], %50 {strides = array<i32>} : memref<1x1x2x128xf32, #tpu.memory_space<vmem>>, vector<1x1x2x128xf32>,
    return
  }
  func.func @transform_0(%arg0: i32, %arg1: i32, %arg2: i32) -> (i32, i32, i32, i32) {
    %c1_i32 = arith.constant 1 : i32
    %0 = arith.muli %arg1, %c1_i32 : i32
    %1 = arith.addi %0, %arg2 : i32
    %c0_i32 = arith.constant 0 : i32
    %c0_i32_0 = arith.constant 0 : i32
    %c0_i32_1 = arith.constant 0 : i32
    return %arg0, %c0_i32, %1, %c0_i32_0 : i32, i32, i32, i32
  }
  func.func @transform_1(%arg0: i32, %arg1: i32, %arg2: i32) -> (i32, i32, i32, i32) {
    %c1_i32 = arith.constant 1 : i32
    %0 = arith.muli %arg1, %c1_i32 : i32
    %1 = arith.addi %0, %arg2 : i32
    %c0_i32 = arith.constant 0 : i32
    %c0_i32_0 = arith.constant 0 : i32
    %c0_i32_1 = arith.constant 0 : i32
    return %arg0, %c0_i32, %1, %c0_i32_0 : i32, i32, i32, i32
  }
  func.func @transform_2(%arg0: i32, %arg1: i32, %arg2: i32) -> (i32, i32, i32, i32) {
    %c1_i32 = arith.constant 1 : i32
    %0 = arith.muli %arg1, %c1_i32 : i32
    %1 = arith.addi %0, %arg2 : i32
    %c0_i32 = arith.constant 0 : i32
    %c0_i32_0 = arith.constant 0 : i32
    %c0_i32_1 = arith.constant 0 : i32
    return %arg0, %c0_i32, %1, %c0_i32_0 : i32, i32, i32, i32
  }
  func.func @transform_3(%arg0: i32, %arg1: i32, %arg2: i32) -> (i32, i32, i32, i32) {
    %c0_i32 = arith.constant 0 : i32
    %c0_i32_0 = arith.constant 0 : i32
    %c0_i32_1 = arith.constant 0 : i32
    return %arg0, %arg1, %c0_i32, %c0_i32_0 : i32, i32, i32, i32
  }
}

</mosaic_0001>

<bundles_post_ra>
// kernel: tpu_custom_call.1
= control target key start
LH: loop header
LB: loop body
LE: loop exit
PB: predicated region body
PF: predicated region fallthrough
CT: control target
= control target key end

     0   :  { %8 = vsyncpa [#allocation3], 0  ;;  %s1029_s0 = inlined_call_operand.hbm [shape: f32[2,4,2,128], index: 0, kind: input, shape index: {}]   ;;  %s1030_s1 = inlined_call_operand.hbm [shape: s32[2,1,2,128], index: 1, kind: input, shape index: {}]   ;;  %s1031_s2 = inlined_call_operand.vmem [shape: f32[2,1,2,128], index: 2, kind: input, shape index: {}]   ;;  %s1032_s3 = inlined_call_operand.hbm [shape: f32[2,1,2,128], index: 3, kind: output, shape index: {}]  }
   0x1   :  { %10 = vsyncpa [#allocation3 + $0x1], 0 }
   0x2   :  { %11 = vsyncpa [#allocation6], 0 }
   0x3   :  { %13 = vsyncpa [#allocation6 + $0x1], 0 }
   0x4   :  { %14 = vsyncpa [#allocation4], 0 }
   0x5   :  { %16 = vsyncpa [#allocation4 + $0x1], 0  ;;  %s791_s12 = smov 0   ;;  %s793_s13 = smov 0  }
   0x6   :  { %s795_s14 = smov 0   ;;  %s797_s15 = smov 0  }
   0x7   :  { %s799_s16 = smov 0   ;;  %s801_s17 = smov 0  }
   0x8 LB: > { %s516_s18 = sadd.s32 4294967295, %s763_s17   ;;  %s517_s19 = sadd.s32 4294967294, %s763_s17   ;;  %s763_s17 = sphi %s801_s17, %s22_s17   ;;  %s759_s16 = sphi %s799_s16, %s1051_s16   ;;  %s755_s15 = sphi %s797_s15, %s1050_s15   ;;  %s751_s14 = sphi %s795_s14, %s1049_s14   ;;  %s747_s13 = sphi %s793_s13, %s1048_s13   ;;  %s743_s12 = sphi %s791_s12, %s1047_s12  }
   0x9   : > { %s41_s20 = sadd.s32 1, %s759_s16  ;;  %s52_s21 = sadd.s32 1, %s751_s14 }
   0xa   : > { %p43_p0 = scmp.ge.s32.totalorder %s41_s20, 2  ;;  %p59_p1 = scmp.ne.s32.totalorder %s751_s14, %s747_s13 }
   0xb   : > { %p60_p2 = scmp.eq.s32.totalorder %s763_s17, 0  ;;  %p65_p3 = scmp.ne.s32.totalorder %s747_s13, %s743_s12 }
   0xc   : > { %s1053_s20 = smov (%p43_p0, %s41_s20), 0  ;;  %p66_p5 = scmp.eq.s32.totalorder %s516_s18, 0 }
   0xd   : > { %p832_p4 = por %p60_p2, %p59_p1  ;;  %s47_s23 = ssub.s32 %s759_s16, %s1053_s20 }
   0xe   : > { %p151_p6 = scmp.eq.s32.totalorder %s516_s18, 1  ;;  %p50_p7 = scmp.eq.s32.totalorder %s47_s23, 0 }
   0xf   : > { %p838_p8 = por %p66_p5, %p65_p3  ;;  %p157_p10 = scmp.eq.s32.totalorder %s517_s19, 1 }
  0x10   : > { %p842_p9 = por %p151_p6, %p59_p1  ;;  %p552_p13 = scmp.lt.s32.totalorder %s763_s17, 2 }
  0x11   : > { %s1036_s24 = scalar_select %p838_p8, 1, 0 }
  0x12   : > { %s1037_s25 = scalar_select %p842_p9, 1, 0 }
  0x13   : > { %s847_s26 = scalar_select %p50_p7, %s751_s14, %s52_s21  }
  0x14   : > { %p849_p11 = por %p157_p10, %p65_p3  ;;  %s856_s28 = sand.u32 1, %s751_s14  }
  0x15   : > { %s520_s29 = sshll.u32 %s856_s28, 3  ;;  %s534_s30 = sshll.u32 %s759_s16, 7 }
  0x16   : > { %s1038_s27 = scalar_select %p849_p11, 1, 0 }
  0x17   : > { %s863_s6 = scalar_lea.hbm %s1029_s0, %s534_s30  ;;  %s181_s7 = scalar_lea.vmem [#allocation2], %s520_s29 }
  0x18   : > { %s190_s8 = sshll.u32 %s181_s7, 4  ;;  %p869_p0 = pnand %p552_p13, %p832_p4  ;;  %s865_s8 = int_to_ptr.vmem [resolvable:$true] %s190_s8 }
  0x19   : > { %s178_s10 = scalar_lea.sflag [#allocation3], %s856_s28  ;;  %s617_s11 = scalar_lea.hbm %s863_s6, 128 }
  0x1a   : > { %p618_p2 = scmp.ne.s32.totalorder %s863_s6, %s617_s11  ;;  %p619_p3 = pneg %p869_p0 }
  0x1b   : > { %s622_s21 = scalar_lea.hbm %s1029_s0, 256  ;;  %p623_p4 = scmp.lt.u32.totalorder %s863_s6, %s1029_s0 }
  0x1c   : > { %p620_p5 = pnand %p619_p3, %p618_p2  ;;  %p624_p7 = scmp.lt.u32.totalorder %s622_s21, %s617_s11 }
  0x1d   : > { %p626_p13 = scmp.lt.u32.totalorder %s617_s11, %s863_s6 }
  0x1e   : > { %p621_p6 = pneg %p620_p5  ;;  %p625_p10 = por %p624_p7, %p623_p4 }
  0x20   : > { %p627_p12 = por %p626_p13, %p625_p10 }
  0x22   : > { %p628_p1 = pnand %p627_p12, %p621_p6 }
  0x24   : > { %631 = shalt.err (!%p628_p1)
}
  0x25   : > { %s632_s29 = scalar_lea.vmem %s865_s8, 128  ;;  %s765_s30 = smov [#allocation2]  }
  0x26   : > { %p633_p2 = scmp.ne.s32.totalorder %s865_s8, %s632_s29  ;;  %s637_s4 = sshll.u32 %s765_s30, 4  ;;  %s638_s4 = int_to_ptr.vmem [resolvable:$false] %s637_s4 }
  0x27   : > { %s639_s5 = scalar_lea.vmem %s638_s4, 256  ;;  %p640_p9 = scmp.lt.s32.totalorder %s865_s8, %s638_s4 }
  0x28   : > { %p635_p5 = pnand %p633_p2, %p619_p3  ;;  %p641_p4 = scmp.lt.s32.totalorder %s639_s5, %s632_s29 }
  0x2a   : > { %p636_p11 = pneg %p635_p5  ;;  %p642_p7 = por %p641_p4, %p640_p9 }
  0x2c   : > { %p643_p10 = pnand %p642_p7, %p636_p11 }
  0x2e   : > { %646 = shalt.err (!%p643_p10)
}
  0x2f   : > { %s766_s7 = smov 32   ;;  %s767_s11 = smov 2  }
  0x30   : > { %544 = dma.hbm_to_vmem [thread:$0]  (!%p869_p0), %s863_s6, 128, %s865_s8, %s178_s10, %s766_s7, %s766_s7, %s767_s11  }
  0x31   : > { %p230_p12 = scmp.lt.s32.totalorder %s763_s17, 3  ;;  %s523_s18 = sshll.u32 %s856_s28, 1 }
  0x32   : > { %s524_s19 = sshll.u32 %s759_s16, 5  ;;  %p1040_p9 = scmp.ge.s32.totalorder %s763_s17, 1 }
  0x33   : > { %s914_s29 = scalar_lea.hbm %s1030_s1, %s524_s19  ;;  %s204_s30 = scalar_lea.vmem [#allocation5], %s523_s18 }
  0x34   : > { %p907_p11 = pnand %p1040_p9, %p230_p12  ;;  %s213_s4 = sshll.u32 %s204_s30, 4  ;;  %s214_s4 = int_to_ptr.vmem [resolvable:$true] %s213_s4 }
  0x35   : > { %s201_s6 = scalar_lea.sflag [#allocation6], %s856_s28  ;;  %s647_s8 = scalar_lea.hbm %s914_s29, 32 }
  0x36   : > { %s1041_s21 = scalar_select %p907_p11, 1, 0 }
  0x37   : > { %p648_p1 = scmp.ne.s32.totalorder %s914_s29, %s647_s8  ;;  %s652_s7 = scalar_lea.hbm %s1030_s1, 64 }
  0x38   : > { %p653_p2 = scmp.lt.u32.totalorder %s914_s29, %s1030_s1  ;;  %p654_p5 = scmp.lt.u32.totalorder %s652_s7, %s647_s8 }
  0x39   : > { %p650_p6 = pnand %p648_p1, %p619_p3  ;;  %p656_p7 = scmp.lt.u32.totalorder %s647_s8, %s914_s29 }
  0x3a   : > { %p655_p4 = por %p654_p5, %p653_p2 }
  0x3b   : > { %p651_p13 = pneg %p650_p6 }
  0x3c   : > { %p657_p10 = por %p656_p7, %p655_p4 }
  0x3e   : > { %p658_p12 = pnand %p657_p10, %p651_p13 }
  0x40   : > { %661 = shalt.err (!%p658_p12)
}
  0x41   : > { %s662_s28 = scalar_lea.vmem %s214_s4, 32  ;;  %s768_s18 = smov [#allocation5]  }
  0x42   : > { %p663_p9 = scmp.ne.s32.totalorder %s214_s4, %s662_s28  ;;  %s667_s22 = sshll.u32 %s768_s18, 4  ;;  %s668_s22 = int_to_ptr.vmem [resolvable:$false] %s667_s22 }
  0x43   : > { %s669_s23 = scalar_lea.vmem %s668_s22, 64  ;;  %p670_p8 = scmp.lt.s32.totalorder %s214_s4, %s668_s22 }
  0x44   : > { %p665_p1 = pnand %p663_p9, %p619_p3  ;;  %p671_p11 = scmp.lt.s32.totalorder %s669_s23, %s662_s28 }
  0x46   : > { %p666_p6 = pneg %p665_p1  ;;  %p672_p2 = por %p671_p11, %p670_p8 }
  0x48   : > { %p673_p5 = pnand %p672_p2, %p666_p6 }
  0x4a   : > { %676 = shalt.err (!%p673_p5)
}
  0x4b   : > { %547 = dma.hbm_to_vmem [thread:$0]  (!%p869_p0), %s914_s29, 32, %s214_s4, %s201_s6  }
  0x4c   : > { %p1042_p13 = scmp.ne.s32.totalorder %s1041_s21, 0 }
  0x4d   : > { %s939_s30 = sand.u32 (!%p1042_p13), 1, %s747_s13   ;;  %p1043_p3 = scmp.ne.s32.totalorder (!%p1042_p13), %s1036_s24, 0 }
  0x4e   : > { %234 = sbr.rel (%p1042_p13) target bundleno = 171 (0xab), region = 32  ;;  %s526_s8 = sshll.u32 (!%p1042_p13), %s939_s30, 3 }
  0x4f   : > { %s237_s10 = scalar_lea.sflag (!%p1042_p13), [#allocation3], %s939_s30  ;;  %s240_s5 = scalar_lea.vmem (!%p1042_p13), [#allocation2], %s526_s8 }
  0x55   : > { %730 = dma.done.wait (%p1043_p3), %s237_s10, 128  }
  0x56   : > { %732 = vsyncadd (%p1043_p3), %s237_s10, 4294967168  ;;  %s527_s9 = sshll.u32 %s939_s30, 1  ;;  %s246_s21 = scalar_lea.sflag [#allocation6], %s939_s30 }
  0x57   : > { %s249_s29 = scalar_lea.vmem [#allocation5], %s527_s9 }
  0x58   : > { %734 = dma.done.wait (%p1043_p3), %s246_s21, 32  }
  0x59   : > { %736 = vsyncadd (%p1043_p3), %s246_s21, 4294967264  ;;  %s953_s4 = scalar_lea.vmem [#allocation7], %s527_s9  ;;  %v769_v0 = vmov 0.0   ;;  %vm307_vm0 = vcmask 1041408   ;;  %v302_v1 = vld [vmem:[%s240_s5] sm:$0x3]  ;;  %v360_v47 = vlaneseq }
  0x5a   : > { %301 = vst [vmem:[%s953_s4] sm:$0x3] %v769_v0  ;;  %v303_v2 = vld [vmem:[%s240_s5 + $0x2] sm:$0x3]  ;;  %v304_v3 = vld [vmem:[%s240_s5 + $0x4] sm:$0x3]  ;;  %v308_v5 = vsel %vm307_vm0, %v302_v1, -inf }
  0x5b   : > { %v305_v4 = vld [vmem:[%s240_s5 + $0x6] sm:$0x3]  ;;  %v309_v6 = vsel %vm307_vm0, %v303_v2, -inf  ;;  %v310_v7 = vsel %vm307_vm0, %v304_v3, -inf  ;;  %v306_v20 = vld [vmem:[%s249_s29] sm:$0x3] }
  0x5c   : > { %v311_v8 = vsel %vm307_vm0, %v305_v4, -inf  ;;  %v312_v9 = vmax.f32 %v308_v5, %v309_v6  ;;  %vm336_vm1 = vcmp.eq.s32.totalorder %v306_v20, 0  ;;  %vm337_vm2 = vcmp.eq.s32.totalorder %v306_v20, 1  ;;  %p288_p8 = scmp.lt.s32.totalorder %s755_s15, 1  ;;  %s531_s28 = sshll.u32 %s755_s15, 5 }
  0x5d   : > { %v313_v10 = vmax.f32 %v310_v7, %v311_v8  ;;  %vm338_vm3 = vcmp.eq.s32.totalorder %v306_v20, 2  ;;  %vm339_vm4 = vcmp.eq.s32.totalorder %v306_v20, 3  ;;  %vm366_vm5 = vcmp.ne.s32.totalorder %v306_v20, 4294967196  ;;  %s391_s18 = sshll.u32 %s953_s4, 4  ;;  %s979_s8 = scalar_lea.hbm %s1032_s3, %s531_s28  ;;  %s981_s18 = int_to_ptr.vmem [resolvable:$true] %s391_s18 }
  0x5e   : > { %s289_s24 = scalar_select %p288_p8, %s755_s15, 1  ;;  %vm367_vm6 = vcmp.ge.s32.totalorder %v306_v20, 0  ;;  %v361_v50 = vshrl.u32 %v360_v47, 7  ;;  %vm369_vm8 = vcmp.lt.s32.totalorder %v306_v20, 4 }
  0x5f   : > { %v314_v11 = vmax.f32 %v312_v9, %v313_v10  ;;  %vm368_vm7 = vmand %vm366_vm5, %vm367_vm6  ;;  %s377_s10 = scalar_lea.sflag [#allocation4], %s939_s30  ;;  %s677_s5 = scalar_lea.vmem %s981_s18, 32 }
  0x60   : > { %s529_s6 = sshll.u32 %s289_s24, 1  ;;  %vm365_vm9 = vcmp.lt.s32.totalorder %v361_v50, 2  ;;  %vm370_vm10 = vmand %vm368_vm7, %vm369_vm8  ;;  %p678_p0 = scmp.ne.s32.totalorder %s981_s18, %s677_s5 }
  0x61   : > { %v315_v12 = vsub.f32 %v302_v1, %v314_v11  ;;  %v316_v13 = vsub.f32 %v303_v2, %v314_v11  ;;  %v317_v14 = vsub.f32 %v304_v3, %v314_v11  ;;  %v318_v15 = vsub.f32 %v305_v4, %v314_v11  ;;  %s294_s19 = scalar_lea.vmem %s1031_s2, %s529_s6  ;;  %vm371_vm11 = vmand %vm370_vm10, %vm365_vm9  ;;  %v372_v56 = vld [vmem:[%s953_s4] sm:$0x3]  ;;  %p1044_p11 = scmp.ne.s32.totalorder %s1037_s25, 0 }
  0x62   : > { %v352_v48 = vld [vmem:[%s294_s19] sm:$0x3]  ;;  %s770_s15 = smov [#allocation7]  }
  0x63   : > { %v319_v16 = vmul.f32 1.442695, %v315_v12  ;;  %v321_v17 = vmul.f32 1.442695, %v316_v13  ;;  %v323_v18 = vmul.f32 1.442695, %v317_v14  ;;  %p679_p4 = pnand %p678_p0, %p1044_p11 }
  0x64   : > { %v325_v19 = vmul.f32 1.442695, %v318_v15  ;;  %v340_v30 = vsel %vm336_vm1, %v315_v12, 0.0  ;;  %v341_v31 = vsel %vm337_vm2, %v316_v13, 0.0  ;;  %v342_v36 = vsel %vm338_vm3, %v317_v14, 0.0  ;;  %s681_s9 = sshll.u32 %s770_s15, 4  ;;  %s682_s9 = int_to_ptr.vmem [resolvable:$false] %s681_s9 }
  0x65   : > { %605 = vpow2.f32 %v319_v16  ;;  %v344_v34 = vsel %vm307_vm0, %v340_v30, 0.0  ;;  %v345_v35 = vsel %vm307_vm0, %v341_v31, 0.0  ;;  %v347_v38 = vsel %vm307_vm0, %v342_v36, 0.0  ;;  %p680_p7 = pneg %p679_p4  ;;  %s683_s21 = scalar_lea.vmem %s682_s9, 64 }
  0x66   : > { %607 = vpow2.f32 %v321_v17  ;;  %v346_v37 = vadd.f32 %v345_v35, %v344_v34  ;;  %v343_v39 = vsel %vm339_vm4, %v318_v15, 0.0  ;;  %v353_v49 = vsub.f32 0.0, %v352_v48  ;;  %p684_p10 = scmp.lt.s32.totalorder %s981_s18, %s682_s9  ;;  %p685_p12 = scmp.lt.s32.totalorder %s683_s21, %s677_s5 }
  0x67   : > { %609 = vpow2.f32 %v323_v18  ;;  %v349_v41 = vsel %vm307_vm0, %v343_v39, 0.0 }
  0x68   : > { %611 = vpow2.f32 %v325_v19  ;;  %v348_v40 = vadd.f32 %v347_v38, %v346_v37  ;;  %p686_p9 = por %p685_p12, %p684_p10 }
  0x6a   : > { %v350_v42 = vadd.f32 %v349_v41, %v348_v40  ;;  %p687_p1 = pnand %p686_p9, %p680_p7 }
  0x6f   : > { %v606_v21 = vpop.eup %605 }
  0x70   : > { %v608_v22 = vpop.eup %607  ;;  %v327_v23 = vsel %vm307_vm0, %v606_v21, 0.0 }
  0x71   : > { %v610_v24 = vpop.eup %609  ;;  %v328_v25 = vsel %vm307_vm0, %v608_v22, 0.0 }
  0x72   : > { %v612_v26 = vpop.eup %611  ;;  %v329_v27 = vadd.f32 %v328_v25, %v327_v23  ;;  %v330_v28 = vsel %vm307_vm0, %v610_v24, 0.0 }
  0x73   : > { %v332_v29 = vsel %vm307_vm0, %v612_v26, 0.0 }
  0x74   : > { %v331_v32 = vadd.f32 %v330_v28, %v329_v27 }
  0x76   : > { %v333_v33 = vadd.f32 %v332_v29, %v331_v32 }
  0x78   : > { %613 = vlog2.f32 %v333_v33 }
  0x82   : > { %v614_v43 = vpop.eup %613 }
  0x83   : > { %v335_v44 = vmul.f32 0.6931472, %v614_v43 }
  0x85   : > { %v351_v45 = vsub.f32 %v350_v42, %v335_v44 }
  0x87   : > { %v355_v46 = vmul.f32 1.442695, %v351_v45  ;;  %v354_v52 = vmul.f32 %v353_v49, %v351_v45 }
  0x89   : > { %615 = vpow2.f32 %v355_v46 }
  0x93   : > { %v616_v51 = vpop.eup %615 }
  0x94   : > { %v357_v53 = vsub.f32 1.0, %v616_v51 }
  0x96   : > { %v358_v54 = vmul.f32 %v357_v53, %v357_v53 }
  0x98   : > { %v359_v55 = vmul.f32 %v358_v54, %v354_v52 }
  0x9a   : > { %v373_v57 = vsel %vm371_vm11, %v359_v55, 0.0 }
  0x9b   : > { %v374_v58 = vadd.f32 %v373_v57, %v372_v56 }
  0x9d   : > { %375 = vst [vmem:[%s953_s4] sm:$0x3] %v374_v58 }
  0x9e   : > { %690 = shalt.err (!%p687_p1)
}
  0x9f   : > { %s691_s30 = scalar_lea.hbm %s979_s8, 32  ;;  %s695_s24 = scalar_lea.hbm %s1032_s3, 64 }
  0xa0   : > { %p692_p6 = scmp.ne.s32.totalorder %s979_s8, %s691_s30  ;;  %p696_p13 = scmp.lt.u32.totalorder %s979_s8, %s1032_s3 }
  0xa1   : > { %p697_p3 = scmp.lt.u32.totalorder %s695_s24, %s691_s30  ;;  %p699_p0 = scmp.lt.u32.totalorder %s691_s30, %s979_s8 }
  0xa2   : > { %p693_p2 = pnand %p692_p6, %p1044_p11 }
  0xa3   : > { %p698_p8 = por %p697_p3, %p696_p13 }
  0xa4   : > { %p694_p5 = pneg %p693_p2 }
  0xa5   : > { %p700_p4 = por %p699_p0, %p698_p8 }
  0xa7   : > { %p701_p7 = pnand %p700_p4, %p694_p5 }
  0xa9   : > { %704 = shalt.err (!%p701_p7)
}
  0xaa   : > { %539 = dma.vmem_to_hbm [thread:$0]  (%p1044_p11), %s981_s18, 32, %s979_s8, %s377_s10  }
  0xab PF: > { %s403_s11 = sand.u32 1, %s743_s12   ;;  %p1045_p10 = scmp.ne.s32.totalorder %s1038_s27, 0 }
  0xac   : > { %p1046_p12 = scmp.ge.s32.totalorder %s763_s17, 2  ;;  %s404_s19 = scalar_lea.sflag [#allocation4], %s403_s11 }
  0xae   : > { %p549_p9 = pnand %p1046_p12, %p1045_p10 }
  0xb0   : > { %738 = dma.done.wait (!%p549_p9), %s404_s19, 32  }
  0xb1   : > { %740 = vsyncadd (!%p549_p9), %s404_s19, 4294967264  ;;  %s22_s17 = sadd.s32 1, %s763_s17   ;;  %s1047_s12 = smov %s747_s13 }
  0xb2   : > { %p19_p1 = scmp.ge.s32.totalorder %s22_s17, 4   ;;  %s1048_s13 = smov %s751_s14 }
  0xb3   : > { %s1049_s14 = smov %s847_s26  ;;  %s1050_s15 = smov %s759_s16 }
  0xb4   : > { %s1051_s16 = smov %s1053_s20  ;;  %21 = sbr.rel (!%p19_p1) target bundleno = 8 (0x8), region = 97 }
  0xbb   :  { %409 = vsyncpa [#allocation3], 1 }
  0xbc   :  { %411 = vsyncpa [#allocation3 + $0x1], 1 }
  0xbd   :  { %412 = vsyncpa [#allocation6], 1 }
  0xbe   :  { %414 = vsyncpa [#allocation6 + $0x1], 1 }
  0xbf   :  { %415 = vsyncpa [#allocation4], 1 }
  0xc0   :  { %417 = vsyncpa [#allocation4 + $0x1], 1 }

</bundles_post_ra>
